<compile_context>
chip_gen: v6e
topology: v6e:2x2x1
jax: 0.10.0
libtpu: 0.0.40
codegen_flags: <defaults>
</compile_context>

<pallas_src>
import math

import jax
import jax.numpy as jnp
from jax.experimental import pallas as pl
from jax.experimental.pallas import tpu as pltpu

_LANE = 128
_SUBLANE = 8


def _round_up(x, m):
    return ((x + m - 1) // m) * m


# ---------------------------------------------------------------------------
# Fused kernel: all layers in one body, activations stay resident
# ---------------------------------------------------------------------------
def _make_fused_kernel(num_layers, relu_flags, compute_dtype):
    def kernel(*refs):
        # refs = (x_ref, w0, b0, w1, b1, ..., o_ref)
        x_ref = refs[0]
        param_refs = refs[1:1 + 2 * num_layers]
        o_ref = refs[-1]

        x = x_ref[...].astype(jnp.float32)
        for i in range(num_layers):
            w = param_refs[2 * i][...]          # (in_i, out_i) in compute_dtype
            b = param_refs[2 * i + 1][...]      # (1, out_i) float32
            y = jnp.dot(x.astype(compute_dtype), w,
                        preferred_element_type=jnp.float32)
            y = y + b
            if relu_flags[i]:
                y = jnp.maximum(y, 0.0)
            x = y
        o_ref[...] = x.astype(o_ref.dtype)

    return kernel


# ---------------------------------------------------------------------------
# Parameter init (matches Predict_MLP._init_weights, eval-mode BN state)
# ---------------------------------------------------------------------------
def init_predict_mlp_params(key, layer_sizes):
    layer_sizes = [int(s) for s in layer_sizes]
    params = []
    gain = math.sqrt(2.0)  # nn.init.calculate_gain('relu')
    eps = 1e-5
    for i in range(len(layer_sizes) - 1):
        fan_in, fan_out = layer_sizes[i], layer_sizes[i + 1]
        key, kw, kb = jax.random.split(key, 3)
        # xavier_uniform_ on PyTorch weight (out,in): bound = gain*sqrt(6/(fan_in+fan_out))
        bound = gain * math.sqrt(6.0 / (fan_in + fan_out))
        w = jax.random.uniform(kw, (fan_in, fan_out), jnp.float32, -bound, bound)
        b = jax.random.uniform(kb, (1, fan_out), jnp.float32, -0.1, 0.1)
        # BatchNorm1d at init: gamma=1, beta=0, running_mean=0, running_var=1
        scale = jnp.full((1, fan_out), 1.0 / math.sqrt(1.0 + eps), jnp.float32)
        shift = jnp.zeros((1, fan_out), jnp.float32)
        params.append({"w": w, "b": b, "scale": scale, "shift": shift})
    return params


# ---------------------------------------------------------------------------
# Forward (single fused pallas_call)
# ---------------------------------------------------------------------------
def predict_mlp_forward(x, params, final_relu=False, tb=256,
                        compute_dtype=jnp.float32):
    num_layers = len(params)
    final_relu_layer = num_layers if final_relu else num_layers - 1
    relu_flags = tuple(i < final_relu_layer for i in range(num_layers))

    # --- Fold BatchNorm into (W', b'); pad last layer to a lane-dense width.
    fused = []
    out_dims = []
    for i, layer in enumerate(params):
        w, b = layer["w"], layer["b"]
        if relu_flags[i]:  # BN present exactly when ReLU is (i < final_relu_layer)
            w = w * layer["scale"]
            b = b * layer["scale"] + layer["shift"]
        out_dims.append(w.shape[1])
        fused.append((w, b))

    out_dim = out_dims[-1]
    out_pad = _round_up(out_dim, _LANE)
    if out_pad != out_dim:
        w_last, b_last = fused[-1]
        w_last = jnp.pad(w_last, ((0, 0), (0, out_pad - out_dim)))
        b_last = jnp.pad(b_last, ((0, 0), (0, out_pad - out_dim)))
        fused[-1] = (w_last, b_last)

    fused = [(w.astype(compute_dtype), b.astype(jnp.float32)) for (w, b) in fused]

    # --- Batch tiling: pad B to a multiple of tb (tb a multiple of 8).
    B, in_dim = x.shape
    tb = max(_SUBLANE, min(int(tb), _round_up(B, _SUBLANE)))
    tb = _round_up(tb, _SUBLANE)
    B_pad = _round_up(B, tb)
    if B_pad != B:
        x = jnp.pad(x, ((0, B_pad - B), (0, 0)))
    grid = (B_pad // tb,)

    # --- Specs: activation tile over the grid, params replicated (untiled).
    in_specs = [pl.BlockSpec((tb, in_dim), lambda i: (i, 0))]
    flat_params = []
    for w, b in fused:
        in_specs.append(pl.BlockSpec(w.shape, lambda i: (0, 0)))
        in_specs.append(pl.BlockSpec(b.shape, lambda i: (0, 0)))
        flat_params.extend([w, b])

    # --- Cost estimate (advisory).
    dims = [in_dim] + out_dims[:-1] + [out_pad]
    flops = sum(2 * B_pad * dims[i] * dims[i + 1] for i in range(num_layers))
    bytes_accessed = (B_pad * in_dim + B_pad * out_pad) * jnp.dtype(x.dtype).itemsize
    for w, b in fused:
        bytes_accessed += w.size * jnp.dtype(w.dtype).itemsize
        bytes_accessed += b.size * jnp.dtype(b.dtype).itemsize

    kernel = _make_fused_kernel(num_layers, relu_flags, compute_dtype)

    out = pl.pallas_call(
        kernel,
        out_shape=jax.ShapeDtypeStruct((B_pad, out_pad), x.dtype),
        grid=grid,
        in_specs=in_specs,
        out_specs=pl.BlockSpec((tb, out_pad), lambda i: (i, 0)),
        compiler_params=pltpu.CompilerParams(dimension_semantics=("parallel",)),
        cost_estimate=pl.CostEstimate(flops=int(flops), transcendentals=0,
                                      bytes_accessed=int(bytes_accessed)),
    )(x, *flat_params)

    return out[:B, :out_dim]


# ---------------------------------------------------------------------------
# Pure-JAX reference (unfused, for correctness)
# ---------------------------------------------------------------------------
def _reference_forward(x, params, final_relu=False):
    num_layers = len(params)
    final_relu_layer = num_layers if final_relu else num_layers - 1
    for i, layer in enumerate(params):
        y = x @ layer["w"] + layer["b"]
        if i < final_relu_layer:
            y = y * layer["scale"] + layer["shift"]
            y = jnp.maximum(y, 0.0)
        x = y
    return x


if __name__ == "__main__":
    # Small shapes consistent with the module: layer_sizes=[32, 64, 32, 3]
    layer_sizes = [32, 64, 32, 3]

    key = jax.random.PRNGKey(0)
    key, kx, kx2 = jax.random.split(key, 3)
    params = init_predict_mlp_params(key, layer_sizes)

    # Case 1: batch divisible by the sublane multiple.
    batch = 8
    x = jax.random.normal(kx, (batch, layer_sizes[0]), jnp.float32)
    out = predict_mlp_forward(x, params, final_relu=False)
    out = jax.block_until_ready(out)
    ref = _reference_forward(x, params, final_relu=False)
    assert out.shape == (batch, layer_sizes[-1])
    assert jnp.allclose(out, ref, atol=1e-4, rtol=1e-4)

    # Case 2: batch NOT a multiple of 8 -> exercises the padding path.
    batch2 = 20
    x2 = jax.random.normal(kx2, (batch2, layer_sizes[0]), jnp.float32)
    out2 = predict_mlp_forward(x2, params, final_relu=False)
    out2 = jax.block_until_ready(out2)
    ref2 = _reference_forward(x2, params, final_relu=False)
    assert out2.shape == (batch2, layer_sizes[-1])
    assert jnp.allclose(out2, ref2, atol=1e-4, rtol=1e-4)

    print("KERNEL_OK")
</pallas_src>

<mosaic_0001>
module attributes {stable_mosaic.version = 11 : i64} {
  func.func @kernel(%arg0: i32, %arg1: memref<8x32xf32, #tpu.memory_space<vmem>>, %arg2: memref<32x64xf32, #tpu.memory_space<vmem>>, %arg3: memref<1x64xf32, #tpu.memory_space<vmem>>, %arg4: memref<64x32xf32, #tpu.memory_space<vmem>>, %arg5: memref<1x32xf32, #tpu.memory_space<vmem>>, %arg6: memref<32x128xf32, #tpu.memory_space<vmem>>, %arg7: memref<1x128xf32, #tpu.memory_space<vmem>>, %arg8: memref<8x128xf32, #tpu.memory_space<vmem>>) attributes {dimension_semantics = [#tpu.dimension_semantics<parallel>], iteration_bounds = array<i64: 1>, scalar_prefetch = 0 : i64, scratch_operands = 0 : i64, tpu.core_type = #tpu.core_type<tc>, window_params = [{transform_indices = @transform_0, window_bounds = array<i64: 8, 32>}, {pipeline_mode = #tpu.pipeline_mode<synchronous>, transform_indices = @transform_1, window_bounds = array<i64: 32, 64>}, {pipeline_mode = #tpu.pipeline_mode<synchronous>, transform_indices = @transform_2, window_bounds = array<i64: 1, 64>}, {pipeline_mode = #tpu.pipeline_mode<synchronous>, transform_indices = @transform_3, window_bounds = array<i64: 64, 32>}, {pipeline_mode = #tpu.pipeline_mode<synchronous>, transform_indices = @transform_4, window_bounds = array<i64: 1, 32>}, {pipeline_mode = #tpu.pipeline_mode<synchronous>, transform_indices = @transform_5, window_bounds = array<i64: 32, 128>}, {pipeline_mode = #tpu.pipeline_mode<synchronous>, transform_indices = @transform_6, window_bounds = array<i64: 1, 128>}, {transform_indices = @transform_7, window_bounds = array<i64: 8, 128>}]} {
    %c0 = arith.constant 0 : index
    %c0_0 = arith.constant 0 : index
    %0 = vector.load %arg1[%c0, %c0_0] : memref<8x32xf32, #tpu.memory_space<vmem>>, vector<8x32xf32>
    %c0_1 = arith.constant 0 : index
    %c0_2 = arith.constant 0 : index
    %1 = vector.load %arg2[%c0_1, %c0_2] : memref<32x64xf32, #tpu.memory_space<vmem>>, vector<32x64xf32>
    %c0_3 = arith.constant 0 : index
    %c0_4 = arith.constant 0 : index
    %2 = vector.load %arg3[%c0_3, %c0_4] : memref<1x64xf32, #tpu.memory_space<vmem>>, vector<1x64xf32>
    %cst = arith.constant dense<0.000000e+00> : vector<8x64xf32>
    %3 = tpu.matmul %0, %1, %cst {dimension_numbers = #tpu.dot_dimension_numbers<[1], [0], [0], [1], [0, 0, 1, 1], [], []>} : vector<8x32xf32>, vector<32x64xf32>, vector<8x64xf32> -> vector<8x64xf32>
    %4 = vector.broadcast %2 : vector<1x64xf32> to vector<8x64xf32>
    %5 = arith.addf %3, %4 : vector<8x64xf32>
    %cst_5 = arith.constant 0.000000e+00 : f32
    %6 = vector.broadcast %cst_5 : f32 to vector<8x64xf32>
    %7 = arith.maximumf %5, %6 : vector<8x64xf32>
    %c0_6 = arith.constant 0 : index
    %c0_7 = arith.constant 0 : index
    %8 = vector.load %arg4[%c0_6, %c0_7] : memref<64x32xf32, #tpu.memory_space<vmem>>, vector<64x32xf32>
    %c0_8 = arith.constant 0 : index
    %c0_9 = arith.constant 0 : index
    %9 = vector.load %arg5[%c0_8, %c0_9] : memref<1x32xf32, #tpu.memory_space<vmem>>, vector<1x32xf32>
    %cst_10 = arith.constant dense<0.000000e+00> : vector<8x32xf32>
    %10 = tpu.matmul %7, %8, %cst_10 {dimension_numbers = #tpu.dot_dimension_numbers<[1], [0], [0], [1], [0, 0, 1, 1], [], []>} : vector<8x64xf32>, vector<64x32xf32>, vector<8x32xf32> -> vector<8x32xf32>
    %11 = vector.broadcast %9 : vector<1x32xf32> to vector<8x32xf32>
    %12 = arith.addf %10, %11 : vector<8x32xf32>
    %cst_11 = arith.constant 0.000000e+00 : f32
    %13 = vector.broadcast %cst_11 : f32 to vector<8x32xf32>
    %14 = arith.maximumf %12, %13 : vector<8x32xf32>
    %c0_12 = arith.constant 0 : index
    %c0_13 = arith.constant 0 : index
    %15 = vector.load %arg6[%c0_12, %c0_13] : memref<32x128xf32, #tpu.memory_space<vmem>>, vector<32x128xf32>
    %c0_14 = arith.constant 0 : index
    %c0_15 = arith.constant 0 : index
    %16 = vector.load %arg7[%c0_14, %c0_15] : memref<1x128xf32, #tpu.memory_space<vmem>>, vector<1x128xf32>
    %cst_16 = arith.constant dense<0.000000e+00> : vector<8x128xf32>
    %17 = tpu.matmul %14, %15, %cst_16 {dimension_numbers = #tpu.dot_dimension_numbers<[1], [0], [0], [1], [0, 0, 1, 1], [], []>} : vector<8x32xf32>, vector<32x128xf32>, vector<8x128xf32> -> vector<8x128xf32>
    %18 = vector.broadcast %16 : vector<1x128xf32> to vector<8x128xf32>
    %19 = arith.addf %17, %18 : vector<8x128xf32>
    %c0_17 = arith.constant 0 : index
    %c0_18 = arith.constant 0 : index
    %20 = vector.load %arg8[%c0_17, %c0_18] : memref<8x128xf32, #tpu.memory_space<vmem>>, vector<8x128xf32>
    tpu.vector_store %arg8[%c0_17, %c0_18], %19 {strides = array<i32>} : memref<8x128xf32, #tpu.memory_space<vmem>>, vector<8x128xf32>,
    return
  }
  func.func @transform_0(%arg0: i32) -> (i32, i32) {
    %c0_i32 = arith.constant 0 : i32
    %c0_i32_0 = arith.constant 0 : i32
    return %arg0, %c0_i32 : i32, i32
  }
  func.func @transform_1(%arg0: i32) -> (i32, i32) {
    %c0_i32 = arith.constant 0 : i32
    %c0_i32_0 = arith.constant 0 : i32
    %c0_i32_1 = arith.constant 0 : i32
    return %c0_i32, %c0_i32_0 : i32, i32
  }
  func.func @transform_2(%arg0: i32) -> (i32, i32) {
    %c0_i32 = arith.constant 0 : i32
    %c0_i32_0 = arith.constant 0 : i32
    %c0_i32_1 = arith.constant 0 : i32
    return %c0_i32, %c0_i32_0 : i32, i32
  }
  func.func @transform_3(%arg0: i32) -> (i32, i32) {
    %c0_i32 = arith.constant 0 : i32
    %c0_i32_0 = arith.constant 0 : i32
    %c0_i32_1 = arith.constant 0 : i32
    return %c0_i32, %c0_i32_0 : i32, i32
  }
  func.func @transform_4(%arg0: i32) -> (i32, i32) {
    %c0_i32 = arith.constant 0 : i32
    %c0_i32_0 = arith.constant 0 : i32
    %c0_i32_1 = arith.constant 0 : i32
    return %c0_i32, %c0_i32_0 : i32, i32
  }
  func.func @transform_5(%arg0: i32) -> (i32, i32) {
    %c0_i32 = arith.constant 0 : i32
    %c0_i32_0 = arith.constant 0 : i32
    %c0_i32_1 = arith.constant 0 : i32
    return %c0_i32, %c0_i32_0 : i32, i32
  }
  func.func @transform_6(%arg0: i32) -> (i32, i32) {
    %c0_i32 = arith.constant 0 : i32
    %c0_i32_0 = arith.constant 0 : i32
    %c0_i32_1 = arith.constant 0 : i32
    return %c0_i32, %c0_i32_0 : i32, i32
  }
  func.func @transform_7(%arg0: i32) -> (i32, i32) {
    %c0_i32 = arith.constant 0 : i32
    %c0_i32_0 = arith.constant 0 : i32
    return %arg0, %c0_i32 : i32, i32
  }
}

</mosaic_0001>

<bundles_post_ra>
// kernel: tpu_custom_call.1
= control target key start
LH: loop header
LB: loop body
LE: loop exit
PB: predicated region body
PF: predicated region fallthrough
CT: control target
= control target key end

     0   :  { %v394_v1 = vmov 0.0   ;;  %vm395_vm0 = vmmov 0   ;;  %s505_s0 = inlined_call_operand.vmem [shape: f32[8,32], index: 0, kind: input, shape index: {}]   ;;  %s506_s1 = inlined_call_operand.vmem [shape: f32[32,64], index: 1, kind: input, shape index: {}]   ;;  %s507_s2 = inlined_call_operand.vmem [shape: f32[1,64], index: 2, kind: input, shape index: {}]   ;;  %s508_s3 = inlined_call_operand.vmem [shape: f32[64,32], index: 3, kind: input, shape index: {}]   ;;  %s509_s4 = inlined_call_operand.vmem [shape: f32[1,32], index: 4, kind: input, shape index: {}]   ;;  %s510_s5 = inlined_call_operand.vmem [shape: f32[32,128], index: 5, kind: input, shape index: {}]   ;;  %s511_s6 = inlined_call_operand.vmem [shape: f32[1,128], index: 6, kind: input, shape index: {}]   ;;  %s512_s7 = inlined_call_operand.hbm [shape: f32[8,128], index: 7, kind: output, shape index: {}]  }
   0x1   :  { %v31_v0 = vld [vmem:[%s506_s1 + $0x18] sm:$0xff]  ;;  %328 = vmatprep.subr.mxu0 %v394_v1  ;;  %v30_v2 = vld [vmem:[%s506_s1 + $0x10] sm:$0xff]  ;;  %336 = vmatprep.mubr.msk.f32.mxu0 %vm395_vm0, %v394_v1  ;;  %v29_v5 = vld [vmem:[%s506_s1 + $0x8] sm:$0xff] }
   0x2   :  { %v121_v3 = vld [vmem:[%s508_s3 + $0x38] sm:$0xff]  ;;  %329 = vmatpush3.msra.mxu0 %v31_v0  ;;  %339 = vmatprep.subr.mxu1 %v394_v1  ;;  %v120_v4 = vld [vmem:[%s508_s3 + $0x30] sm:$0xff] }
   0x3   :  { %330 = vmatprep.subr.mxu0 %v394_v1  ;;  %340 = vmatpush3.msra.mxu1 %v121_v3 }
   0x4   :  { %12 = vsyncpa [#allocation3], 0  ;;  %331 = vmatpush3.msra.mxu0 %v30_v2  ;;  %341 = vmatprep.subr.mxu1 %v394_v1  ;;  %v119_v6 = vld [vmem:[%s508_s3 + $0x28] sm:$0xff]  ;;  %v28_v7 = vld [vmem:[%s506_s1] sm:$0xff]  ;;  %vm39_vm1 = vcmask 261120   ;;  %vm129_vm2 = vcmask 523264  }
   0x5   :  { %332 = vmatprep.subr.mxu0 %v394_v1  ;;  %342 = vmatpush3.msra.mxu1 %v120_v4  ;;  %v27_v8 = vld [vmem:[%s505_s0] sm:$0xff]  ;;  %v117_v10 = vld [vmem:[%s508_s3 + $0x18] sm:$0xff]  ;;  %v116_v11 = vld [vmem:[%s508_s3 + $0x10] sm:$0xff]  ;;  %s396_s14 = smov [#allocation2]  }
   0x6   :  { %333 = vmatpush3.msra.mxu0 %v29_v5  ;;  %343 = vmatprep.subr.mxu1 %v394_v1  ;;  %v118_v9 = vld [vmem:[%s508_s3 + $0x20] sm:$0xff]  ;;  %v115_v12 = vld [vmem:[%s508_s3 + $0x8] sm:$0xff]  ;;  %v207_v14 = vld [vmem:[%s510_s5 + $0x18] sm:$0xff]  ;;  %s295_s15 = sshll.u32 %s396_s14, 4  ;;  %s296_s15 = int_to_ptr.vmem [resolvable:$true] %s295_s15 }
   0x7   :  { %334 = vmatprep.subr.mxu0 %v394_v1  ;;  %344 = vmatpush3.msra.mxu1 %v119_v6  ;;  %v114_v13 = vld [vmem:[%s508_s3] sm:$0xff]  ;;  %v206_v20 = vld [vmem:[%s510_s5 + $0x10] sm:$0xff]  ;;  %v205_v21 = vld [vmem:[%s510_s5 + $0x8] sm:$0xff]  ;;  %p377_p1 = scmp.lt.s32.totalorder %s296_s15, %s296_s15 }
   0x8   :  { %335 = vmatpush3.msra.mxu0 %v28_v7  ;;  %345 = vmatprep.subr.mxu1 %v394_v1  ;;  %v303_v15 = vld [vmem:[%s507_s2] ss:$0 sm:$0xff] }
   0x9   :  { %337 = vmatmul.mubr.msk.f32.vlgmr.msra.gmra.mxu0 %vm39_vm1, %v27_v8  ;;  %346 = vmatpush3.msra.mxu1 %v118_v9  ;;  %v204_v22 = vld [vmem:[%s510_s5] sm:$0xff]  ;;  %s372_s5 = scalar_lea.vmem %s296_s15, 128 }
   0xa   :  { %347 = vmatprep.subr.mxu1 %v394_v1  ;;  %355 = vmatprep.mubr.msk.f32.mxu1 %vm395_vm0, %v394_v1  ;;  %v305_v23 = vld [vmem:[%s509_s4] ss:$0 sm:$0xff]  ;;  %p373_p0 = scmp.ne.s32.totalorder %s296_s15, %s372_s5  ;;  %p378_p2 = scmp.lt.s32.totalorder %s372_s5, %s372_s5 }
   0xb   :  { %348 = vmatpush3.msra.mxu1 %v117_v10  ;;  %358 = vmatprep.subr.mxu0 %v394_v1  ;;  %v307_v28 = vld [vmem:[%s511_s6] ss:$0 sm:$0xff] }
   0xc   :  { %349 = vmatprep.subr.mxu1 %v394_v1  ;;  %366 = vmatprep.mubr.msk.f32.mxu0 %vm395_vm0, %v394_v1  ;;  %p379_p3 = por %p378_p2, %p377_p1 }
   0xd   :  { %350 = vmatpush3.msra.mxu1 %v116_v11  ;;  %359 = vmatpush3.msra.mxu0 %v207_v14 }
   0xe   :  { %351 = vmatprep.subr.mxu1 %v394_v1  ;;  %360 = vmatprep.subr.mxu0 %v394_v1  ;;  %p380_p4 = pnand %p379_p3, %p373_p0 }
   0xf   :  { %352 = vmatpush3.msra.mxu1 %v115_v12  ;;  %361 = vmatpush3.msra.mxu0 %v206_v20 }
  0x10   :  { %353 = vmatprep.subr.mxu1 %v394_v1  ;;  %362 = vmatprep.subr.mxu0 %v394_v1 }
  0x11   :  { %354 = vmatpush3.msra.mxu1 %v114_v13  ;;  %363 = vmatpush3.msra.mxu0 %v205_v21 }
  0x12   :  { %364 = vmatprep.subr.mxu0 %v394_v1 }
  0x13   :  { %365 = vmatpush3.msra.mxu0 %v204_v22 }
  0xc9   :  { %v109_v16 = vpop.f32.mrf.mxu0 }
  0xca   :  { %v110_v17 = vadd.f32 %v303_v15, %v109_v16 }
  0xcb   :  { %v338_v18 = vpop.f32.mrf.mxu0 }
  0xcc   :  { %v113_v19 = vmax.f32 %v110_v17, 0.0 }
  0xce   :  { %356 = vmatmul.mubr.msk.f32.vlgmr.msra.gmra.mxu1 %vm129_vm2, %v113_v19 }
 0x18e   :  { %v199_v24 = vpop.f32.mrf.mxu1 }
 0x18f   :  { %v200_v25 = vadd.f32 %v305_v23, %v199_v24 }
 0x190   :  { %v357_v26 = vpop.f32.mrf.mxu1 }
 0x191   :  { %v203_v27 = vmax.f32 %v200_v25, 0.0 }
 0x193   :  { %367 = vmatmul.mubr.msk.f32.vlgmr.msra.gmra.mxu0 %vm39_vm1, %v203_v27 }
 0x253   :  { %v284_v29 = vpop.f32.mrf.mxu0 }
 0x254   :  { %v285_v30 = vadd.f32 %v307_v28, %v284_v29 }
 0x255   :  { %v368_v31 = vpop.f32.mrf.mxu0 }
 0x256   :  { %288 = vst [vmem:[#allocation2] sm:$0xff] %v285_v30 }
 0x257   :  { %383 = shalt.err (!%p380_p4)
}
 0x258   :  { %298 = dma.vmem_to_hbm [thread:$0]  %s296_s15, 128, %s512_s7, [#allocation3]  }
 0x259   :  { %392 = dma.done.wait [#allocation3], 128  }
 0x25a   :  { %393 = vsyncadd [#allocation3], 4294967168 }
 0x25b   :  { %302 = vsyncpa [#allocation3], 1 }

</bundles_post_ra>
